<compile_context>
chip_gen: v7x
topology: tpu7x:2x2x1
jax: 0.10.0
libtpu: 0.0.40
codegen_flags: <defaults>
</compile_context>

<pallas_src>
import functools

import jax
import jax.numpy as jnp
from jax.experimental import pallas as pl
from jax.experimental.pallas import tpu as pltpu


def _round_up(n, m):
    return ((n + m - 1) // m) * m


def ffn_kernel(x_ref, w1_ref, b1_ref, w2_ref, b2_ref, out_ref, *, mxu_dtype):
    # x_ref:  (TM, H)      w1_ref: (H, F)   b1_ref: (1, F)
    # w2_ref: (F, H)       b2_ref: (1, H)   out_ref: (TM, H)
    x = x_ref[...]

    # layer1 + ReLU (bias add / ReLU in f32 on the VPU; matmul on the MXU).
    h = jnp.dot(x.astype(mxu_dtype), w1_ref[...],
                preferred_element_type=jnp.float32)
    h = jnp.maximum(h + b1_ref[...], 0.0)

    # layer2
    y = jnp.dot(h.astype(mxu_dtype), w2_ref[...],
                preferred_element_type=jnp.float32)
    out_ref[...] = (y + b2_ref[...]).astype(out_ref.dtype)


@functools.partial(jax.jit, static_argnames=("mxu_bf16", "block_rows"))
def feed_forward_network(x, params, *, mxu_bf16=False, block_rows=512):
    """x: (..., hidden) float32 -> (..., hidden) float32."""
    w1, b1, w2, b2 = params           # torch Linear shapes: w1 (F,H), w2 (H,F)
    hidden = x.shape[-1]
    ffn = w1.shape[0]
    lead = x.shape[:-1]

    n_rows = 1
    for s in lead:
        n_rows *= s
    x2 = x.reshape(n_rows, hidden).astype(jnp.float32)

    mxu_dtype = jnp.bfloat16 if mxu_bf16 else jnp.float32
    w1_t = w1.T.astype(mxu_dtype)                    # (H, F)
    w2_t = w2.T.astype(mxu_dtype)                    # (F, H)
    b1_r = b1.reshape(1, ffn).astype(jnp.float32)
    b2_r = b2.reshape(1, hidden).astype(jnp.float32)

    # Row tile: multiple of 8 (f32 sublanes), capped so VMEM stays comfortable
    # on all chips.  Pad rows so the grid covers everything (no dropped tail).
    tm = min(block_rows, _round_up(n_rows, 8))
    n_pad = _round_up(n_rows, tm)
    if n_pad != n_rows:
        x2 = jnp.pad(x2, ((0, n_pad - n_rows), (0, 0)))
    grid = (n_pad // tm,)

    w_bytes = (w1_t.size + w2_t.size) * jnp.dtype(mxu_dtype).itemsize
    cost = pl.CostEstimate(
        flops=4 * n_pad * hidden * ffn,              # two (M,K)x(K,N) matmuls
        transcendentals=0,
        bytes_accessed=2 * n_pad * hidden * 4 + w_bytes
        + (b1_r.size + b2_r.size) * 4,
    )

    kernel = functools.partial(ffn_kernel, mxu_dtype=mxu_dtype)

    out = pl.pallas_call(
        kernel,
        out_shape=jax.ShapeDtypeStruct((n_pad, hidden), jnp.float32),
        grid_spec=pltpu.PrefetchScalarGridSpec(
            num_scalar_prefetch=0,
            grid=grid,
            in_specs=[
                pl.BlockSpec((tm, hidden), lambda i: (i, 0)),     # x rows
                pl.BlockSpec((hidden, ffn), lambda i: (0, 0)),    # w1^T
                pl.BlockSpec((1, ffn), lambda i: (0, 0)),         # b1
                pl.BlockSpec((ffn, hidden), lambda i: (0, 0)),    # w2^T
                pl.BlockSpec((1, hidden), lambda i: (0, 0)),      # b2
            ],
            out_specs=pl.BlockSpec((tm, hidden), lambda i: (i, 0)),
        ),
        compiler_params=pltpu.CompilerParams(
            dimension_semantics=("parallel",),
            vmem_limit_bytes=32 * 1024 * 1024,
        ),
        cost_estimate=cost,
    )(x2, w1_t, b1_r, w2_t, b2_r)

    return out[:n_rows].reshape(*lead, hidden)


def init_params(key, hidden, ffn):
    """Deterministic synthetic parameters matching nn.Linear shapes."""
    ks = jax.random.split(key, 4)
    # nn.Linear(in, out): weight (out, in), bias (out,)
    w1 = jax.random.normal(ks[0], (ffn, hidden), jnp.float32) / jnp.sqrt(hidden)
    b1 = jax.random.normal(ks[1], (ffn,), jnp.float32) * 0.1
    w2 = jax.random.normal(ks[2], (hidden, ffn), jnp.float32) / jnp.sqrt(ffn)
    b2 = jax.random.normal(ks[3], (hidden,), jnp.float32) * 0.1
    return (w1, b1, w2, b2)


def reference_forward(x, params):
    """Pure-JAX reference mirroring the PyTorch forward."""
    w1, b1, w2, b2 = params
    h = jnp.maximum(jnp.einsum('...h,fh->...f', x, w1) + b1, 0.0)
    return jnp.einsum('...f,hf->...h', h, w2) + b2


if __name__ == "__main__":
    # Small shapes consistent with the module; hidden/ffn chosen lane-dense
    # (multiples of 128) per the performance review.
    B, S = 2, 16
    HIDDEN, FFN = 128, 256        # args.embedding_size, args.encoder_ffn_size

    key = jax.random.PRNGKey(0)
    k_x, k_p = jax.random.split(key)
    x = jax.random.normal(k_x, (B, S, HIDDEN), jnp.float32)
    params = init_params(k_p, HIDDEN, FFN)

    ref = reference_forward(x, params)

    # f32 MXU path (tight check).
    out = feed_forward_network(x, params, mxu_bf16=False)
    out = jax.block_until_ready(out)
    assert out.shape == (B, S, HIDDEN), out.shape
    assert jnp.allclose(out, ref, atol=2e-3, rtol=2e-3), float(
        jnp.max(jnp.abs(out - ref)))

    # bf16 MXU path for v6e/v7x (looser check; f32 accumulation).
    out_bf16 = feed_forward_network(x, params, mxu_bf16=True)
    out_bf16 = jax.block_until_ready(out_bf16)
    assert jnp.allclose(out_bf16, ref, atol=8e-2, rtol=8e-2), float(
        jnp.max(jnp.abs(out_bf16 - ref)))

    print("KERNEL_OK")
</pallas_src>

<mosaic_0001>
module attributes {stable_mosaic.version = 11 : i64} {
  func.func @ffn_kernel(%arg0: i32, %arg1: memref<32x128xf32, #tpu.memory_space<vmem>>, %arg2: memref<128x256xf32, #tpu.memory_space<vmem>>, %arg3: memref<1x256xf32, #tpu.memory_space<vmem>>, %arg4: memref<256x128xf32, #tpu.memory_space<vmem>>, %arg5: memref<1x128xf32, #tpu.memory_space<vmem>>, %arg6: memref<32x128xf32, #tpu.memory_space<vmem>>) attributes {dimension_semantics = [#tpu.dimension_semantics<parallel>], iteration_bounds = array<i64: 1>, scalar_prefetch = 0 : i64, scratch_operands = 0 : i64, tpu.core_type = #tpu.core_type<tc>, window_params = [{transform_indices = @transform_0, window_bounds = array<i64: 32, 128>}, {pipeline_mode = #tpu.pipeline_mode<synchronous>, transform_indices = @transform_1, window_bounds = array<i64: 128, 256>}, {pipeline_mode = #tpu.pipeline_mode<synchronous>, transform_indices = @transform_2, window_bounds = array<i64: 1, 256>}, {pipeline_mode = #tpu.pipeline_mode<synchronous>, transform_indices = @transform_3, window_bounds = array<i64: 256, 128>}, {pipeline_mode = #tpu.pipeline_mode<synchronous>, transform_indices = @transform_4, window_bounds = array<i64: 1, 128>}, {transform_indices = @transform_5, window_bounds = array<i64: 32, 128>}]} {
    %c0 = arith.constant 0 : index
    %c0_0 = arith.constant 0 : index
    %0 = vector.load %arg1[%c0, %c0_0] : memref<32x128xf32, #tpu.memory_space<vmem>>, vector<32x128xf32>
    %c0_1 = arith.constant 0 : index
    %c0_2 = arith.constant 0 : index
    %1 = vector.load %arg2[%c0_1, %c0_2] : memref<128x256xf32, #tpu.memory_space<vmem>>, vector<128x256xf32>
    %cst = arith.constant dense<0.000000e+00> : vector<32x256xf32>
    %2 = tpu.matmul %0, %1, %cst {dimension_numbers = #tpu.dot_dimension_numbers<[1], [0], [0], [1], [0, 0, 1, 1], [], []>} : vector<32x128xf32>, vector<128x256xf32>, vector<32x256xf32> -> vector<32x256xf32>
    %c0_3 = arith.constant 0 : index
    %c0_4 = arith.constant 0 : index
    %3 = vector.load %arg3[%c0_3, %c0_4] : memref<1x256xf32, #tpu.memory_space<vmem>>, vector<1x256xf32>
    %4 = vector.broadcast %3 : vector<1x256xf32> to vector<32x256xf32>
    %5 = arith.addf %2, %4 : vector<32x256xf32>
    %cst_5 = arith.constant 0.000000e+00 : f32
    %6 = vector.broadcast %cst_5 : f32 to vector<32x256xf32>
    %7 = arith.maximumf %5, %6 : vector<32x256xf32>
    %c0_6 = arith.constant 0 : index
    %c0_7 = arith.constant 0 : index
    %8 = vector.load %arg4[%c0_6, %c0_7] : memref<256x128xf32, #tpu.memory_space<vmem>>, vector<256x128xf32>
    %cst_8 = arith.constant dense<0.000000e+00> : vector<32x128xf32>
    %9 = tpu.matmul %7, %8, %cst_8 {dimension_numbers = #tpu.dot_dimension_numbers<[1], [0], [0], [1], [0, 0, 1, 1], [], []>} : vector<32x256xf32>, vector<256x128xf32>, vector<32x128xf32> -> vector<32x128xf32>
    %c0_9 = arith.constant 0 : index
    %c0_10 = arith.constant 0 : index
    %10 = vector.load %arg5[%c0_9, %c0_10] : memref<1x128xf32, #tpu.memory_space<vmem>>, vector<1x128xf32>
    %11 = vector.broadcast %10 : vector<1x128xf32> to vector<32x128xf32>
    %12 = arith.addf %9, %11 : vector<32x128xf32>
    %c0_11 = arith.constant 0 : index
    %c0_12 = arith.constant 0 : index
    %13 = vector.load %arg6[%c0_11, %c0_12] : memref<32x128xf32, #tpu.memory_space<vmem>>, vector<32x128xf32>
    tpu.vector_store %arg6[%c0_11, %c0_12], %12 {strides = array<i32>} : memref<32x128xf32, #tpu.memory_space<vmem>>, vector<32x128xf32>,
    return
  }
  func.func @transform_0(%arg0: i32) -> (i32, i32) {
    %c0_i32 = arith.constant 0 : i32
    %c0_i32_0 = arith.constant 0 : i32
    return %arg0, %c0_i32 : i32, i32
  }
  func.func @transform_1(%arg0: i32) -> (i32, i32) {
    %c0_i32 = arith.constant 0 : i32
    %c0_i32_0 = arith.constant 0 : i32
    %c0_i32_1 = arith.constant 0 : i32
    return %c0_i32, %c0_i32_0 : i32, i32
  }
  func.func @transform_2(%arg0: i32) -> (i32, i32) {
    %c0_i32 = arith.constant 0 : i32
    %c0_i32_0 = arith.constant 0 : i32
    %c0_i32_1 = arith.constant 0 : i32
    return %c0_i32, %c0_i32_0 : i32, i32
  }
  func.func @transform_3(%arg0: i32) -> (i32, i32) {
    %c0_i32 = arith.constant 0 : i32
    %c0_i32_0 = arith.constant 0 : i32
    %c0_i32_1 = arith.constant 0 : i32
    return %c0_i32, %c0_i32_0 : i32, i32
  }
  func.func @transform_4(%arg0: i32) -> (i32, i32) {
    %c0_i32 = arith.constant 0 : i32
    %c0_i32_0 = arith.constant 0 : i32
    %c0_i32_1 = arith.constant 0 : i32
    return %c0_i32, %c0_i32_0 : i32, i32
  }
  func.func @transform_5(%arg0: i32) -> (i32, i32) {
    %c0_i32 = arith.constant 0 : i32
    %c0_i32_0 = arith.constant 0 : i32
    return %arg0, %c0_i32 : i32, i32
  }
}

</mosaic_0001>

<bundles_post_ra>
// kernel: feed_forward_network.1
= control target key start
LH: loop header
LB: loop body
LE: loop exit
PB: predicated region body
PF: predicated region fallthrough
CT: control target
= control target key end

     0   :  { %v447_v7 = vmov 0.0   ;;  %s707_s0 = inlined_call_operand.vmem [shape: f32[32,128], index: 0, kind: input, shape index: {}]   ;;  %s708_s1 = inlined_call_operand.vmem [shape: f32[128,256], index: 1, kind: input, shape index: {}]   ;;  %s709_s2 = inlined_call_operand.vmem [shape: f32[1,256], index: 2, kind: input, shape index: {}]   ;;  %s710_s3 = inlined_call_operand.vmem [shape: f32[256,128], index: 3, kind: input, shape index: {}]   ;;  %s711_s4 = inlined_call_operand.vmem [shape: f32[1,128], index: 4, kind: input, shape index: {}]   ;;  %s712_s5 = inlined_call_operand.hbm [shape: f32[32,128], index: 5, kind: output, shape index: {}]  }
   0x1   :  { %v26_v0 = vld [vmem:[%s708_s1 + $0x8] sm:$0xff]  ;;  %v28_v1 = vld [vmem:[%s708_s1 + $0x18] sm:$0xff]  ;;  %v25_v2 = vld [vmem:[%s708_s1] sm:$0xff]  ;;  %133 = vmatprep.mubr.f32.mxu0 %v447_v7 }
   0x2   :  { %v355_v3 = vpack.c.bf16 %v28_v1, %v26_v0  ;;  %v27_v4 = vld [vmem:[%s708_s1 + $0x10] sm:$0xff]  ;;  %v30_v5 = vld [vmem:[%s708_s1 + $0x28] sm:$0xff]  ;;  %v32_v6 = vld [vmem:[%s708_s1 + $0x38] sm:$0xff] }
   0x3   :  { %v357_v8 = vpack.c.bf16 %v27_v4, %v25_v2  ;;  %v359_v9 = vpack.c.bf16 %v32_v6, %v30_v5  ;;  %v29_v10 = vld [vmem:[%s708_s1 + $0x20] sm:$0xff]  ;;  %v31_v11 = vld [vmem:[%s708_s1 + $0x30] sm:$0xff]  ;;  %v34_v12 = vld [vmem:[%s708_s1 + $0x48] sm:$0xff] }
   0x4   :  { %356 = vmatprep.subr.bf16.mxu0 %v355_v3  ;;  %v36_v13 = vld [vmem:[%s708_s1 + $0x58] sm:$0xff]  ;;  %v361_v14 = vpack.c.bf16 %v31_v11, %v29_v10  ;;  %v33_v16 = vld [vmem:[%s708_s1 + $0x40] sm:$0xff]  ;;  %v35_v17 = vld [vmem:[%s708_s1 + $0x50] sm:$0xff] }
   0x5   :  { %358 = vmatpush1.bf16.msra.mxu0 %v357_v8  ;;  %v363_v15 = vpack.c.bf16 %v36_v13, %v34_v12  ;;  %v38_v18 = vld [vmem:[%s708_s1 + $0x68] sm:$0xff]  ;;  %v40_v19 = vld [vmem:[%s708_s1 + $0x78] sm:$0xff]  ;;  %v365_v20 = vpack.c.bf16 %v35_v17, %v33_v16  ;;  %v37_v22 = vld [vmem:[%s708_s1 + $0x60] sm:$0xff] }
   0x6   :  { %360 = vmatprep.subr.bf16.mxu0 %v359_v9  ;;  %v367_v21 = vpack.c.bf16 %v40_v19, %v38_v18  ;;  %v39_v23 = vld [vmem:[%s708_s1 + $0x70] sm:$0xff]  ;;  %v42_v24 = vld [vmem:[%s708_s1 + $0x88] sm:$0xff]  ;;  %v44_v25 = vld [vmem:[%s708_s1 + $0x98] sm:$0xff] }
   0x7   :  { %v41_v26 = vld [vmem:[%s708_s1 + $0x80] sm:$0xff]  ;;  %v43_v27 = vld [vmem:[%s708_s1 + $0x90] sm:$0xff]  ;;  %v369_v28 = vpack.c.bf16 %v39_v23, %v37_v22  ;;  %v46_v29 = vld [vmem:[%s708_s1 + $0xa8] sm:$0xff]  ;;  %v371_v34 = vpack.c.bf16 %v44_v25, %v42_v24 }
   0x8   :  { %v48_v30 = vld [vmem:[%s708_s1 + $0xb8] sm:$0xff]  ;;  %v182_v31 = vld [vmem:[%s710_s3 + $0x80] sm:$0xff]  ;;  %v183_v32 = vld [vmem:[%s710_s3 + $0x88] sm:$0xff]  ;;  %v373_v45 = vpack.c.bf16 %v43_v27, %v41_v26 }
   0x9   :  { %362 = vmatpush1.bf16.msra.mxu0 %v361_v14  ;;  %v166_v33 = vld [vmem:[%s710_s3] sm:$0xff]  ;;  %v387_v35 = vpack.c.bf16 %v183_v32, %v182_v31  ;;  %v167_v36 = vld [vmem:[%s710_s3 + $0x8] sm:$0xff]  ;;  %v184_v37 = vld [vmem:[%s710_s3 + $0x90] sm:$0xff]  ;;  %v375_v49 = vpack.c.bf16 %v48_v30, %v46_v29 }
   0xa   :  { %364 = vmatprep.subr.bf16.mxu0 %v363_v15  ;;  %v185_v38 = vld [vmem:[%s710_s3 + $0x98] sm:$0xff]  ;;  %v389_v39 = vpack.c.bf16 %v167_v36, %v166_v33  ;;  %v168_v41 = vld [vmem:[%s710_s3 + $0x10] sm:$0xff]  ;;  %v186_v43 = vld [vmem:[%s710_s3 + $0xa0] sm:$0xff] }
   0xb   :  { %v391_v40 = vpack.c.bf16 %v185_v38, %v184_v37  ;;  %v169_v42 = vld [vmem:[%s710_s3 + $0x18] sm:$0xff]  ;;  %388 = vmatprep.subr.bf16.mxu1 %v387_v35  ;;  %v187_v44 = vld [vmem:[%s710_s3 + $0xa8] sm:$0xff]  ;;  %v45_v46 = vld [vmem:[%s708_s1 + $0xa0] sm:$0xff] }
   0xc   :  { %v47_v47 = vld [vmem:[%s708_s1 + $0xb0] sm:$0xff]  ;;  %390 = vmatpush3.bf16.msra.mxu1 %v389_v39  ;;  %v393_v48 = vpack.c.bf16 %v169_v42, %v168_v41  ;;  %v50_v50 = vld [vmem:[%s708_s1 + $0xc8] sm:$0xff]  ;;  %v395_v51 = vpack.c.bf16 %v187_v44, %v186_v43  ;;  %v170_v52 = vld [vmem:[%s710_s3 + $0x20] sm:$0xff] }
   0xd   :  { %366 = vmatpush1.bf16.msra.mxu0 %v365_v20  ;;  %392 = vmatprep.subr.bf16.mxu1 %v391_v40  ;;  %v171_v53 = vld [vmem:[%s710_s3 + $0x28] sm:$0xff]  ;;  %v52_v54 = vld [vmem:[%s708_s1 + $0xd8] sm:$0xff]  ;;  %v188_v55 = vld [vmem:[%s710_s3 + $0xb0] sm:$0xff]  ;;  %v377_v57 = vpack.c.bf16 %v47_v47, %v45_v46 }
   0xe   :  { %368 = vmatprep.subr.bf16.mxu0 %v367_v21  ;;  %v189_v56 = vld [vmem:[%s710_s3 + $0xb8] sm:$0xff]  ;;  %v49_v58 = vld [vmem:[%s708_s1 + $0xc0] sm:$0xff]  ;;  %v51_v59 = vld [vmem:[%s708_s1 + $0xd0] sm:$0xff]  ;;  %v397_v61 = vpack.c.bf16 %v171_v53, %v170_v52  ;;  %v379_v62 = vpack.c.bf16 %v52_v54, %v50_v50 }
   0xf   :  { %v54_v60 = vld [vmem:[%s708_s1 + $0xe8] sm:$0xff]  ;;  %v399_v63 = vpack.c.bf16 %v189_v56, %v188_v55  ;;  %v172_v0 = vld [vmem:[%s710_s3 + $0x30] sm:$0xff]  ;;  %v173_v1 = vld [vmem:[%s710_s3 + $0x38] sm:$0xff] }
  0x10   :  { %394 = vmatpush3.bf16.msra.mxu1 %v393_v48 }
  0x11   :  { %370 = vmatpush1.bf16.msra.mxu0 %v369_v28  ;;  %396 = vmatprep.subr.bf16.mxu1 %v395_v51 }
  0x12   :  { %372 = vmatprep.subr.bf16.mxu0 %v371_v34 }
  0x15   :  { %374 = vmatpush1.bf16.msra.mxu0 %v373_v45 }
  0x16   :  { %376 = vmatprep.subr.bf16.mxu0 %v375_v49 }
  0x17   :  { %10 = vsyncpa [#allocation3], 0  ;;  %v56_v2 = vld [vmem:[%s708_s1 + $0xf8] sm:$0xff]  ;;  %v190_v3 = vld [vmem:[%s710_s3 + $0xc0] sm:$0xff]  ;;  %v381_v5 = vpack.c.bf16 %v51_v59, %v49_v58  ;;  %398 = vmatpush3.bf16.msra.mxu1 %v397_v61  ;;  %v401_v8 = vpack.c.bf16 %v173_v1, %v172_v0  ;;  %v59_v37 = vlaneseq  ;;  %s448_s28 = smov [#allocation2]  }
  0x18   :  { %v191_v4 = vld [vmem:[%s710_s3 + $0xc8] sm:$0xff]  ;;  %v53_v6 = vld [vmem:[%s708_s1 + $0xe0] sm:$0xff]  ;;  %v383_v9 = vpack.c.bf16 %v56_v2, %v54_v60  ;;  %v55_v10 = vld [vmem:[%s708_s1 + $0xf0] sm:$0xff]  ;;  %400 = vmatprep.subr.bf16.mxu1 %v399_v63  ;;  %s299_s29 = sshll.u32 %s448_s28, 4  ;;  %s300_s29 = int_to_ptr.vmem [resolvable:$true] %s299_s29 }
  0x19   :  { %378 = vmatpush1.bf16.msra.mxu0 %v377_v57  ;;  %v403_v11 = vpack.c.bf16 %v191_v4, %v190_v3  ;;  %v174_v12 = vld [vmem:[%s710_s3 + $0x40] sm:$0xff]  ;;  %v175_v13 = vld [vmem:[%s710_s3 + $0x48] sm:$0xff]  ;;  %v192_v14 = vld [vmem:[%s710_s3 + $0xd0] sm:$0xff]  ;;  %v385_v16 = vpack.c.bf16 %v55_v10, %v53_v6  ;;  %v60_v38 = vshrl.u32 %v59_v37, 7  ;;  %p428_p1 = scmp.lt.s32.totalorder %s300_s29, %s300_s29 }
  0x1a   :  { %380 = vmatprep.subr.bf16.mxu0 %v379_v62  ;;  %v193_v15 = vld [vmem:[%s710_s3 + $0xd8] sm:$0xff]  ;;  %v405_v17 = vpack.c.bf16 %v175_v13, %v174_v12  ;;  %v176_v19 = vld [vmem:[%s710_s3 + $0x50] sm:$0xff]  ;;  %v194_v21 = vld [vmem:[%s710_s3 + $0xe0] sm:$0xff] }
  0x1b   :  { %402 = vmatpush3.bf16.msra.mxu1 %v401_v8  ;;  %v407_v18 = vpack.c.bf16 %v193_v15, %v192_v14  ;;  %v177_v20 = vld [vmem:[%s710_s3 + $0x58] sm:$0xff]  ;;  %v195_v22 = vld [vmem:[%s710_s3 + $0xe8] sm:$0xff]  ;;  %v21_v23 = vld [vmem:[%s707_s0] sm:$0xff]  ;;  %v61_v39 = vsub.s32 0, %v60_v38  ;;  %v65_v41 = vsub.s32 1, %v60_v38 }
  0x1c   :  { %404 = vmatprep.subr.bf16.mxu1 %v403_v11  ;;  %v409_v24 = vpack.c.bf16 %v177_v20, %v176_v19  ;;  %v411_v25 = vpack.c.bf16 %v195_v22, %v194_v21  ;;  %v22_v26 = vld [vmem:[%s707_s0 + $0x8] sm:$0xff]  ;;  %v23_v27 = vld [vmem:[%s707_s0 + $0x10] sm:$0xff]  ;;  %v24_v28 = vld [vmem:[%s707_s0 + $0x18] sm:$0xff] }
  0x1d   :  { %382 = vmatpush1.bf16.msra.mxu0 %v381_v5  ;;  %v178_v29 = vld [vmem:[%s710_s3 + $0x60] sm:$0xff]  ;;  %v179_v30 = vld [vmem:[%s710_s3 + $0x68] sm:$0xff]  ;;  %v196_v32 = vld [vmem:[%s710_s3 + $0xf0] sm:$0xff] }
  0x1e   :  { %384 = vmatprep.subr.bf16.mxu0 %v383_v9  ;;  %v413_v31 = vpack.c.bf16 %v179_v30, %v178_v29  ;;  %v180_v34 = vld [vmem:[%s710_s3 + $0x70] sm:$0xff]  ;;  %v181_v35 = vld [vmem:[%s710_s3 + $0x78] sm:$0xff]  ;;  %v57_v40 = vld [vmem:[%s709_s2] sm:$0x3] }
  0x1f   :  { %406 = vmatpush3.bf16.msra.mxu1 %v405_v17  ;;  %v417_v36 = vpack.c.bf16 %v181_v35, %v180_v34  ;;  %v62_v42 = vrot.slane %v57_v40, %v61_v39  ;;  %v66_v43 = vrot.slane %v57_v40, %v65_v41  ;;  %v310_v5 = vld [vmem:[%s711_s4] ss:$0 sm:$0xff]  ;;  %s423_s4 = scalar_lea.vmem %s300_s29, 512 }
  0x20   :  { %408 = vmatprep.subr.bf16.mxu1 %v407_v18  ;;  %p424_p0 = scmp.ne.s32.totalorder %s300_s29, %s423_s4  ;;  %p429_p2 = scmp.lt.s32.totalorder %s423_s4, %s423_s4 }
  0x21   :  { %386 = vmatpush1.bf16.msra.mxu0 %v385_v16 }
  0x22   :  { %p430_p3 = por %p429_p2, %p428_p1 }
  0x23   :  { %410 = vmatpush3.bf16.msra.mxu1 %v409_v24 }
  0x24   :  { %134 = vmatmul.mubr.f32.vlgmr.msra.gmra.mrb[0].mxu0 %v21_v23  ;;  %412 = vmatprep.subr.bf16.mxu1 %v411_v25  ;;  %p431_p4 = pnand %p430_p3, %p424_p0 }
  0x25   :  { %139 = vmatprep.mubr.f32.mxu0 %v447_v7 }
  0x27   :  { %414 = vmatpush3.bf16.msra.mxu1 %v413_v31 }
  0x28   :  { %140 = vmatmul.mubr.f32.gmra.mrb[2].mxu0 %v22_v26 }
  0x29   :  { %145 = vmatprep.mubr.f32.mxu0 %v447_v7 }
  0x2c   :  { %146 = vmatmul.mubr.f32.gmra.mrb[4].mxu0 %v23_v27 }
  0x2d   :  { %151 = vmatprep.mubr.f32.mxu0 %v447_v7  ;;  %v197_v7 = vld [vmem:[%s710_s3 + $0xf8] sm:$0xff] }
  0x2e   :  { %v415_v33 = vpack.c.bf16 %v197_v7, %v196_v32 }
  0x30   :  { %152 = vmatmul.mubr.f32.gmra.mrb[6].mxu0 %v24_v28  ;;  %416 = vmatprep.subr.bf16.mxu1 %v415_v33 }
  0x31   :  { %418 = vmatpush3.bf16.msra.mxu1 %v417_v36 }
  0xf7   :  { %v135_v44 = vpop.f32.mrb[0].mxu0 }
  0xf8   :  { %v136_v45 = vadd.f32 %v135_v44, %v62_v42  ;;  %v137_v46 = vpop.f32.mrb[1].mxu0 }
  0xf9   :  { %v138_v47 = vadd.f32 %v137_v46, %v66_v43 }
  0xfa   :  { %v158_v50 = vmax.f32 %v136_v45, 0.0 }
  0xfb   :  { %v141_v48 = vpop.f32.mrb[2].mxu0  ;;  %v159_v49 = vmax.f32 %v138_v47, 0.0 }
  0xfc   :  { %v142_v51 = vadd.f32 %v141_v48, %v62_v42  ;;  %v143_v52 = vpop.f32.mrb[3].mxu0 }
  0xfd   :  { %v144_v53 = vadd.f32 %v143_v52, %v66_v43  ;;  %269 = vmatprep.mubr.f32.mxu1 %v159_v49 }
  0xfe   :  { %270 = vmatmul.mubr.f32.vlgmr.msra.gmra.mrb[0].mxu1 %v158_v50  ;;  %v160_v56 = vmax.f32 %v142_v51, 0.0 }
  0xff   :  { %v161_v54 = vmax.f32 %v144_v53, 0.0  ;;  %v147_v55 = vpop.f32.mrb[4].mxu0 }
 0x100   :  { %v148_v57 = vadd.f32 %v147_v55, %v62_v42  ;;  %v149_v58 = vpop.f32.mrb[5].mxu0 }
 0x101   :  { %v150_v59 = vadd.f32 %v149_v58, %v66_v43  ;;  %274 = vmatprep.mubr.f32.mxu1 %v161_v54 }
 0x102   :  { %275 = vmatmul.mubr.f32.gmra.mrb[2].mxu1 %v160_v56  ;;  %v162_v62 = vmax.f32 %v148_v57, 0.0 }
 0x103   :  { %v163_v60 = vmax.f32 %v150_v59, 0.0  ;;  %v153_v61 = vpop.f32.mrb[6].mxu0 }
 0x104   :  { %v154_v63 = vadd.f32 %v153_v61, %v62_v42  ;;  %v155_v0 = vpop.f32.mrb[7].mxu0 }
 0x105   :  { %v156_v1 = vadd.f32 %v155_v0, %v66_v43  ;;  %279 = vmatprep.mubr.f32.mxu1 %v163_v60 }
 0x106   :  { %280 = vmatmul.mubr.f32.gmra.mrb[4].mxu1 %v162_v62  ;;  %v164_v3 = vmax.f32 %v154_v63, 0.0 }
 0x107   :  { %v165_v2 = vmax.f32 %v156_v1, 0.0 }
 0x109   :  { %284 = vmatprep.mubr.f32.mxu1 %v165_v2 }
 0x10a   :  { %285 = vmatmul.mubr.f32.gmra.mrb[6].mxu1 %v164_v3 }
 0x1d1   :  { %v343_v4 = vpop.f32.mrb[0].mxu1 }
 0x1d2   :  { %v344_v6 = vpop.f32.mrb[1].mxu1 }
 0x1d3   :  { %v345_v8 = vadd.f32 %v344_v6, %v343_v4 }
 0x1d5   :  { %v272_v9 = vadd.f32 %v345_v8, %v310_v5  ;;  %v346_v10 = vpop.f32.mrb[2].mxu1 }
 0x1d6   :  { %v347_v11 = vpop.f32.mrb[3].mxu1 }
 0x1d7   :  { %290 = vst [vmem:[#allocation2] sm:$0xff] %v272_v9  ;;  %v348_v12 = vadd.f32 %v347_v11, %v346_v10 }
 0x1d9   :  { %v277_v13 = vadd.f32 %v348_v12, %v310_v5  ;;  %v349_v14 = vpop.f32.mrb[4].mxu1 }
 0x1da   :  { %v350_v15 = vpop.f32.mrb[5].mxu1 }
 0x1db   :  { %291 = vst [vmem:[#allocation2 + $0x8] sm:$0xff] %v277_v13  ;;  %v351_v16 = vadd.f32 %v350_v15, %v349_v14 }
 0x1dd   :  { %v282_v17 = vadd.f32 %v351_v16, %v310_v5  ;;  %v352_v18 = vpop.f32.mrb[6].mxu1 }
 0x1de   :  { %v353_v19 = vpop.f32.mrb[7].mxu1 }
 0x1df   :  { %292 = vst [vmem:[#allocation2 + $0x10] sm:$0xff] %v282_v17  ;;  %v354_v20 = vadd.f32 %v353_v19, %v352_v18 }
 0x1e1   :  { %v287_v21 = vadd.f32 %v354_v20, %v310_v5 }
 0x1e3   :  { %293 = vst [vmem:[#allocation2 + $0x18] sm:$0xff] %v287_v21 }
 0x1e4   :  { %434 = shalt.err (!%p431_p4)
}
 0x1e5   :  { %s435_s7 = scalar_lea.hbm %s712_s5, 512 }
 0x1e6   :  { %p436_p5 = scmp.ne.s32.totalorder %s712_s5, %s435_s7  ;;  %p439_p6 = scmp.lt.u32.totalorder %s435_s7, %s712_s5 }
 0x1e8   :  { %p441_p7 = pnand %p439_p6, %p436_p5 }
 0x1ea   :  { %444 = shalt.err (!%p441_p7)
}
 0x1eb   :  { %s449_s12 = smov 128   ;;  %s450_s13 = smov 8  }
 0x1ec   :  { %305 = dma.vmem_to_hbm [thread:$0]  %s300_s29, 512, %s712_s5, [#allocation3], %s449_s12, %s449_s12, %s450_s13  }
 0x1ed   :  { %445 = dma.done.wait [#allocation3], 512  }
 0x1ee   :  { %446 = vsyncadd [#allocation3], 4294966784 }
 0x1ef   :  { %309 = vsyncpa [#allocation3], 1 }

</bundles_post_ra>
